<compile_context>
chip_gen: v6e
topology: v6e:2x2x1
jax: 0.10.0
libtpu: 0.0.40
codegen_flags: <defaults>
</compile_context>

<pallas_src>
import functools

import jax
import jax.numpy as jnp
from jax.experimental import pallas as pl
from jax.experimental.pallas import tpu as pltpu

MAX_STEP = 20


def _round_up(x, m):
    return ((x + m - 1) // m) * m


def _cdiv(a, b):
    return -(-a // b)


def _tile_vmem_bytes(shape, dtype):
    """Conservative VMEM footprint of one block (sublane/lane padding)."""
    itemsize = jnp.dtype(dtype).itemsize
    sub = 8 * max(1, 4 // itemsize)          # 8 (f32) / 16 (bf16) sublane packing
    lead = 1
    for d in shape[:-2]:
        lead *= int(d)
    s = _round_up(int(shape[-2]), sub)
    l = _round_up(int(shape[-1]), 128)
    return lead * s * l * itemsize


def _choose_tiles(M_total, G, E, H, x_dt, w_dt, o_dt):
    """Pick (TM, TN) so the resident working set fits VMEM on v5e/v6e/v7x."""
    W_BUDGET = 16 << 20        # weight slab budget (single-buffered when large)
    TOTAL_BUDGET = 40 << 20    # all blocks; leaves headroom inside v7x's 64 MiB

    # H (N) tiling only when the whole (G, E, H) weight slab is too big.
    if H <= 256 or _tile_vmem_bytes((G, E, H), w_dt) <= W_BUDGET:
        TN = H
    else:
        TN = 256               # 256-multiples fill the v6e/v7x 2x256x256 MXU
        while TN + 256 < H and _tile_vmem_bytes((G, E, TN + 256), w_dt) <= W_BUDGET:
            TN += 256
        # TODO(synk): if even (G, E, 256) exceeds the budget (huge E), add
        # K/E tiling with an f32 VMEM accumulator.
    w_bytes = _tile_vmem_bytes((G, E, TN), w_dt)

    def blk_bytes(tm):
        return (2 * _tile_vmem_bytes((tm, G, E), x_dt)       # x, double-buffered
                + 2 * _tile_vmem_bytes((tm, G, TN), o_dt))   # out, double-buffered

    TM = min(512, M_total)     # big tiles amortize the ~0.35 us per-step cost
    while TM > 8 and w_bytes + blk_bytes(TM) > TOTAL_BUDGET:
        TM = max(8, TM // 2)

    # v7x megacore: expose >= 2 grid steps when there is enough work.
    if _cdiv(H, TN) * _cdiv(M_total, TM) < 2 and M_total >= 16:
        TM = _cdiv(M_total, 2)
    if TM >= 8:
        TM = (TM // 8) * 8     # sublane-align the matmul M dim when possible

    return TM, TN, w_bytes + blk_bytes(TM)


def vaw_encoder_forward(word_rep, cnn, *, compute_dtype=jnp.bfloat16):
    """word_rep: (B, L, E); cnn: (MAX_STEP, E, H).

    Returns (hidden[B, L, H], hidden[:, -1]) with
        hidden[:, i] = word_rep[:, i] @ cnn[i % MAX_STEP].

    compute_dtype: MXU operand dtype.  bf16 (default) uses the native bf16 MXU
    path on all TPU generations (accumulation stays f32); pass jnp.float32 for
    results matching the f32 PyTorch reference to ~1e-5.
    """
    B, L, E = word_rep.shape
    _, _, H = cnn.shape
    out_dtype = word_rep.dtype

    # Grouping: position i = r*G + g uses cnn[g] (matches i % MAX_STEP both for
    # L < 20 and L >= 20).  The reshape below is a pure split/merge of adjacent
    # dims -> no HBM data movement.
    G = min(L, MAX_STEP)
    R = _cdiv(L, G)
    L_pad = R * G

    x = word_rep
    if L_pad != L:
        # TODO(synk): only remaining extra HBM pass; absent when L <= 20 or L % 20 == 0.
        x = jnp.pad(x, ((0, 0), (0, L_pad - L), (0, 0)))
    x = x.reshape(B * R, G, E)                     # free reshape

    w = cnn[:G].astype(compute_dtype)              # small; read once by the kernel

    M_total = B * R
    TM, TN, est_bytes = _choose_tiles(M_total, G, E, H, x.dtype, w.dtype, out_dtype)
    n_tiles = _cdiv(H, TN)
    grid = (n_tiles, _cdiv(M_total, TM))           # N outer -> weight slab DMA'd once

    def kernel(x_ref, w_ref, o_ref):
        # x_ref: (TM, G, E)  caller dtype (DMA stays at input width)
        # w_ref: (G, E, TN)  compute dtype; resident across the inner M loop
        # o_ref: (TM, G, TN) output dtype
        for g in range(G):                         # static unroll, G <= 20
            xg = x_ref[:, g, :].astype(compute_dtype)          # cast in-kernel (VPU)
            yg = jnp.dot(xg, w_ref[g], preferred_element_type=jnp.float32)
            o_ref[:, g, :] = yg.astype(o_ref.dtype)

    # Single-buffer the weight slab when it is large: its block index changes
    # only on the outer N axis, so at most n_tiles-1 exposed DMAs per call.
    w_spec_kwargs = {}
    if _tile_vmem_bytes((G, E, TN), w.dtype) > (4 << 20):
        w_spec_kwargs["pipeline_mode"] = pl.Buffered(1)

    cost = pl.CostEstimate(
        flops=2 * M_total * G * E * H,
        transcendentals=0,
        bytes_accessed=int(n_tiles * M_total * G * E * jnp.dtype(x.dtype).itemsize
                           + G * E * H * jnp.dtype(w.dtype).itemsize
                           + M_total * G * H * jnp.dtype(out_dtype).itemsize),
    )

    out = pl.pallas_call(
        kernel,
        out_shape=jax.ShapeDtypeStruct((M_total, G, H), out_dtype),
        grid_spec=pltpu.PrefetchScalarGridSpec(
            num_scalar_prefetch=0,
            grid=grid,
            in_specs=[
                pl.BlockSpec((TM, G, E), lambda n, m: (m, 0, 0)),
                pl.BlockSpec((G, E, TN), lambda n, m: (0, 0, n), **w_spec_kwargs),
            ],
            out_specs=pl.BlockSpec((TM, G, TN), lambda n, m: (m, 0, n)),
        ),
        compiler_params=pltpu.CompilerParams(
            dimension_semantics=("parallel", "parallel"),
            vmem_limit_bytes=int(max(est_bytes + (8 << 20), 32 << 20)),
        ),
        cost_estimate=cost,
    )(x, w)

    hidden = out.reshape(B, L_pad, H)              # free inverse reshape
    if L_pad != L:
        hidden = hidden[:, :L]
    return hidden, hidden[:, -1]


def make_params(embed_dim, hidden_dim, key):
    # Matches nn.Parameter(torch.randn(...).uniform_(-0.1, 0.1)):
    # uniform(-0.1, 0.1) of shape (MAX_STEP, E, H).
    k_cnn, _ = jax.random.split(key)
    cnn = jax.random.uniform(
        k_cnn, (MAX_STEP, embed_dim, hidden_dim),
        minval=-0.1, maxval=0.1, dtype=jnp.float32)
    # TODO(synk): self.proj (nn.Linear) is constructed but never used in forward; omitted.
    return cnn


if __name__ == "__main__":
    key = jax.random.PRNGKey(0)
    k_x, k_p, k_x2 = jax.random.split(key, 3)

    B, L, E, H = 2, 8, 16, 32
    word_rep = jax.random.normal(k_x, (B, L, E), dtype=jnp.float32)
    cnn = make_params(E, H, k_p)

    def ref_forward(wr, w):
        return jnp.stack(
            [wr[:, i] @ w[i % MAX_STEP] for i in range(wr.shape[1])], axis=1)

    # 1) Exact f32 path (matches the PyTorch reference numerically).
    fwd_f32 = jax.jit(functools.partial(vaw_encoder_forward,
                                        compute_dtype=jnp.float32))
    hidden, last = fwd_f32(word_rep, cnn)
    jax.block_until_ready((hidden, last))
    ref = ref_forward(word_rep, cnn)
    assert hidden.shape == (B, L, H) and last.shape == (B, H)
    assert jnp.allclose(hidden, ref, atol=1e-5, rtol=1e-5)
    assert jnp.allclose(last, ref[:, -1], atol=1e-5, rtol=1e-5)

    # 2) Default bf16-MXU path, with L > MAX_STEP to exercise the weight-group
    #    reshape, the ragged L tail and partial M blocks.
    B2, L2 = 2, 45
    word_rep2 = jax.random.normal(k_x2, (B2, L2, E), dtype=jnp.float32)
    fwd_bf16 = jax.jit(vaw_encoder_forward)
    hidden2, last2 = fwd_bf16(word_rep2, cnn)
    jax.block_until_ready((hidden2, last2))
    ref2 = ref_forward(word_rep2, cnn)
    assert hidden2.shape == (B2, L2, H) and last2.shape == (B2, H)
    assert jnp.allclose(hidden2, ref2, atol=2e-2, rtol=2e-2)
    assert jnp.allclose(last2, ref2[:, -1], atol=2e-2, rtol=2e-2)

    print("KERNEL_OK")
</pallas_src>

<mosaic_0001>
module attributes {stable_mosaic.version = 11 : i64} {
  func.func @kernel(%arg0: i32, %arg1: i32, %arg2: memref<2x8x16xf32, #tpu.memory_space<vmem>>, %arg3: memref<8x16x32xf32, #tpu.memory_space<vmem>>, %arg4: memref<2x8x32xf32, #tpu.memory_space<vmem>>) attributes {dimension_semantics = [#tpu.dimension_semantics<parallel>, #tpu.dimension_semantics<parallel>], iteration_bounds = array<i64: 1, 1>, scalar_prefetch = 0 : i64, scratch_operands = 0 : i64, tpu.core_type = #tpu.core_type<tc>, window_params = [{transform_indices = @transform_0, window_bounds = array<i64: 2, 8, 16>}, {transform_indices = @transform_1, window_bounds = array<i64: 8, 16, 32>}, {transform_indices = @transform_2, window_bounds = array<i64: 2, 8, 32>}]} {
    %c0 = arith.constant 0 : index
    %c0_0 = arith.constant 0 : index
    %c0_1 = arith.constant 0 : index
    %0 = vector.load %arg2[%c0, %c0_0, %c0_1] : memref<2x8x16xf32, #tpu.memory_space<vmem>>, vector<2x1x16xf32>
    %1 = vector.shape_cast %0 : vector<2x1x16xf32> to vector<2x16xf32>
    %c0_2 = arith.constant 0 : index
    %c0_3 = arith.constant 0 : index
    %c0_4 = arith.constant 0 : index
    %2 = vector.load %arg3[%c0_2, %c0_3, %c0_4] : memref<8x16x32xf32, #tpu.memory_space<vmem>>, vector<1x16x32xf32>
    %3 = vector.shape_cast %2 : vector<1x16x32xf32> to vector<16x32xf32>
    %cst = arith.constant dense<0.000000e+00> : vector<2x32xf32>
    %4 = tpu.matmul %1, %3, %cst {dimension_numbers = #tpu.dot_dimension_numbers<[1], [0], [0], [1], [0, 0, 1, 1], [], []>} : vector<2x16xf32>, vector<16x32xf32>, vector<2x32xf32> -> vector<2x32xf32>
    %c0_5 = arith.constant 0 : index
    %c0_6 = arith.constant 0 : index
    %c0_7 = arith.constant 0 : index
    %5 = vector.load %arg4[%c0_5, %c0_6, %c0_7] : memref<2x8x32xf32, #tpu.memory_space<vmem>>, vector<2x1x32xf32>
    %6 = vector.shape_cast %5 : vector<2x1x32xf32> to vector<2x32xf32>
    %7 = vector.shape_cast %4 : vector<2x32xf32> to vector<2x1x32xf32>
    tpu.vector_store %arg4[%c0_5, %c0_6, %c0_7], %7 {strides = array<i32>} : memref<2x8x32xf32, #tpu.memory_space<vmem>>, vector<2x1x32xf32>,
    %c0_8 = arith.constant 0 : index
    %c1 = arith.constant 1 : index
    %c0_9 = arith.constant 0 : index
    %8 = vector.load %arg2[%c0_8, %c1, %c0_9] : memref<2x8x16xf32, #tpu.memory_space<vmem>>, vector<2x1x16xf32>
    %9 = vector.shape_cast %8 : vector<2x1x16xf32> to vector<2x16xf32>
    %c1_10 = arith.constant 1 : index
    %c0_11 = arith.constant 0 : index
    %c0_12 = arith.constant 0 : index
    %10 = vector.load %arg3[%c1_10, %c0_11, %c0_12] : memref<8x16x32xf32, #tpu.memory_space<vmem>>, vector<1x16x32xf32>
    %11 = vector.shape_cast %10 : vector<1x16x32xf32> to vector<16x32xf32>
    %cst_13 = arith.constant dense<0.000000e+00> : vector<2x32xf32>
    %12 = tpu.matmul %9, %11, %cst_13 {dimension_numbers = #tpu.dot_dimension_numbers<[1], [0], [0], [1], [0, 0, 1, 1], [], []>} : vector<2x16xf32>, vector<16x32xf32>, vector<2x32xf32> -> vector<2x32xf32>
    %c0_14 = arith.constant 0 : index
    %c1_15 = arith.constant 1 : index
    %c0_16 = arith.constant 0 : index
    %13 = vector.load %arg4[%c0_14, %c1_15, %c0_16] : memref<2x8x32xf32, #tpu.memory_space<vmem>>, vector<2x1x32xf32>
    %14 = vector.shape_cast %13 : vector<2x1x32xf32> to vector<2x32xf32>
    %15 = vector.shape_cast %12 : vector<2x32xf32> to vector<2x1x32xf32>
    tpu.vector_store %arg4[%c0_14, %c1_15, %c0_16], %15 {strides = array<i32>} : memref<2x8x32xf32, #tpu.memory_space<vmem>>, vector<2x1x32xf32>,
    %c0_17 = arith.constant 0 : index
    %c2 = arith.constant 2 : index
    %c0_18 = arith.constant 0 : index
    %16 = vector.load %arg2[%c0_17, %c2, %c0_18] : memref<2x8x16xf32, #tpu.memory_space<vmem>>, vector<2x1x16xf32>
    %17 = vector.shape_cast %16 : vector<2x1x16xf32> to vector<2x16xf32>
    %c2_19 = arith.constant 2 : index
    %c0_20 = arith.constant 0 : index
    %c0_21 = arith.constant 0 : index
    %18 = vector.load %arg3[%c2_19, %c0_20, %c0_21] : memref<8x16x32xf32, #tpu.memory_space<vmem>>, vector<1x16x32xf32>
    %19 = vector.shape_cast %18 : vector<1x16x32xf32> to vector<16x32xf32>
    %cst_22 = arith.constant dense<0.000000e+00> : vector<2x32xf32>
    %20 = tpu.matmul %17, %19, %cst_22 {dimension_numbers = #tpu.dot_dimension_numbers<[1], [0], [0], [1], [0, 0, 1, 1], [], []>} : vector<2x16xf32>, vector<16x32xf32>, vector<2x32xf32> -> vector<2x32xf32>
    %c0_23 = arith.constant 0 : index
    %c2_24 = arith.constant 2 : index
    %c0_25 = arith.constant 0 : index
    %21 = vector.load %arg4[%c0_23, %c2_24, %c0_25] : memref<2x8x32xf32, #tpu.memory_space<vmem>>, vector<2x1x32xf32>
    %22 = vector.shape_cast %21 : vector<2x1x32xf32> to vector<2x32xf32>
    %23 = vector.shape_cast %20 : vector<2x32xf32> to vector<2x1x32xf32>
    tpu.vector_store %arg4[%c0_23, %c2_24, %c0_25], %23 {strides = array<i32>} : memref<2x8x32xf32, #tpu.memory_space<vmem>>, vector<2x1x32xf32>,
    %c0_26 = arith.constant 0 : index
    %c3 = arith.constant 3 : index
    %c0_27 = arith.constant 0 : index
    %24 = vector.load %arg2[%c0_26, %c3, %c0_27] : memref<2x8x16xf32, #tpu.memory_space<vmem>>, vector<2x1x16xf32>
    %25 = vector.shape_cast %24 : vector<2x1x16xf32> to vector<2x16xf32>
    %c3_28 = arith.constant 3 : index
    %c0_29 = arith.constant 0 : index
    %c0_30 = arith.constant 0 : index
    %26 = vector.load %arg3[%c3_28, %c0_29, %c0_30] : memref<8x16x32xf32, #tpu.memory_space<vmem>>, vector<1x16x32xf32>
    %27 = vector.shape_cast %26 : vector<1x16x32xf32> to vector<16x32xf32>
    %cst_31 = arith.constant dense<0.000000e+00> : vector<2x32xf32>
    %28 = tpu.matmul %25, %27, %cst_31 {dimension_numbers = #tpu.dot_dimension_numbers<[1], [0], [0], [1], [0, 0, 1, 1], [], []>} : vector<2x16xf32>, vector<16x32xf32>, vector<2x32xf32> -> vector<2x32xf32>
    %c0_32 = arith.constant 0 : index
    %c3_33 = arith.constant 3 : index
    %c0_34 = arith.constant 0 : index
    %29 = vector.load %arg4[%c0_32, %c3_33, %c0_34] : memref<2x8x32xf32, #tpu.memory_space<vmem>>, vector<2x1x32xf32>
    %30 = vector.shape_cast %29 : vector<2x1x32xf32> to vector<2x32xf32>
    %31 = vector.shape_cast %28 : vector<2x32xf32> to vector<2x1x32xf32>
    tpu.vector_store %arg4[%c0_32, %c3_33, %c0_34], %31 {strides = array<i32>} : memref<2x8x32xf32, #tpu.memory_space<vmem>>, vector<2x1x32xf32>,
    %c0_35 = arith.constant 0 : index
    %c4 = arith.constant 4 : index
    %c0_36 = arith.constant 0 : index
    %32 = vector.load %arg2[%c0_35, %c4, %c0_36] : memref<2x8x16xf32, #tpu.memory_space<vmem>>, vector<2x1x16xf32>
    %33 = vector.shape_cast %32 : vector<2x1x16xf32> to vector<2x16xf32>
    %c4_37 = arith.constant 4 : index
    %c0_38 = arith.constant 0 : index
    %c0_39 = arith.constant 0 : index
    %34 = vector.load %arg3[%c4_37, %c0_38, %c0_39] : memref<8x16x32xf32, #tpu.memory_space<vmem>>, vector<1x16x32xf32>
    %35 = vector.shape_cast %34 : vector<1x16x32xf32> to vector<16x32xf32>
    %cst_40 = arith.constant dense<0.000000e+00> : vector<2x32xf32>
    %36 = tpu.matmul %33, %35, %cst_40 {dimension_numbers = #tpu.dot_dimension_numbers<[1], [0], [0], [1], [0, 0, 1, 1], [], []>} : vector<2x16xf32>, vector<16x32xf32>, vector<2x32xf32> -> vector<2x32xf32>
    %c0_41 = arith.constant 0 : index
    %c4_42 = arith.constant 4 : index
    %c0_43 = arith.constant 0 : index
    %37 = vector.load %arg4[%c0_41, %c4_42, %c0_43] : memref<2x8x32xf32, #tpu.memory_space<vmem>>, vector<2x1x32xf32>
    %38 = vector.shape_cast %37 : vector<2x1x32xf32> to vector<2x32xf32>
    %39 = vector.shape_cast %36 : vector<2x32xf32> to vector<2x1x32xf32>
    tpu.vector_store %arg4[%c0_41, %c4_42, %c0_43], %39 {strides = array<i32>} : memref<2x8x32xf32, #tpu.memory_space<vmem>>, vector<2x1x32xf32>,
    %c0_44 = arith.constant 0 : index
    %c5 = arith.constant 5 : index
    %c0_45 = arith.constant 0 : index
    %40 = vector.load %arg2[%c0_44, %c5, %c0_45] : memref<2x8x16xf32, #tpu.memory_space<vmem>>, vector<2x1x16xf32>
    %41 = vector.shape_cast %40 : vector<2x1x16xf32> to vector<2x16xf32>
    %c5_46 = arith.constant 5 : index
    %c0_47 = arith.constant 0 : index
    %c0_48 = arith.constant 0 : index
    %42 = vector.load %arg3[%c5_46, %c0_47, %c0_48] : memref<8x16x32xf32, #tpu.memory_space<vmem>>, vector<1x16x32xf32>
    %43 = vector.shape_cast %42 : vector<1x16x32xf32> to vector<16x32xf32>
    %cst_49 = arith.constant dense<0.000000e+00> : vector<2x32xf32>
    %44 = tpu.matmul %41, %43, %cst_49 {dimension_numbers = #tpu.dot_dimension_numbers<[1], [0], [0], [1], [0, 0, 1, 1], [], []>} : vector<2x16xf32>, vector<16x32xf32>, vector<2x32xf32> -> vector<2x32xf32>
    %c0_50 = arith.constant 0 : index
    %c5_51 = arith.constant 5 : index
    %c0_52 = arith.constant 0 : index
    %45 = vector.load %arg4[%c0_50, %c5_51, %c0_52] : memref<2x8x32xf32, #tpu.memory_space<vmem>>, vector<2x1x32xf32>
    %46 = vector.shape_cast %45 : vector<2x1x32xf32> to vector<2x32xf32>
    %47 = vector.shape_cast %44 : vector<2x32xf32> to vector<2x1x32xf32>
    tpu.vector_store %arg4[%c0_50, %c5_51, %c0_52], %47 {strides = array<i32>} : memref<2x8x32xf32, #tpu.memory_space<vmem>>, vector<2x1x32xf32>,
    %c0_53 = arith.constant 0 : index
    %c6 = arith.constant 6 : index
    %c0_54 = arith.constant 0 : index
    %48 = vector.load %arg2[%c0_53, %c6, %c0_54] : memref<2x8x16xf32, #tpu.memory_space<vmem>>, vector<2x1x16xf32>
    %49 = vector.shape_cast %48 : vector<2x1x16xf32> to vector<2x16xf32>
    %c6_55 = arith.constant 6 : index
    %c0_56 = arith.constant 0 : index
    %c0_57 = arith.constant 0 : index
    %50 = vector.load %arg3[%c6_55, %c0_56, %c0_57] : memref<8x16x32xf32, #tpu.memory_space<vmem>>, vector<1x16x32xf32>
    %51 = vector.shape_cast %50 : vector<1x16x32xf32> to vector<16x32xf32>
    %cst_58 = arith.constant dense<0.000000e+00> : vector<2x32xf32>
    %52 = tpu.matmul %49, %51, %cst_58 {dimension_numbers = #tpu.dot_dimension_numbers<[1], [0], [0], [1], [0, 0, 1, 1], [], []>} : vector<2x16xf32>, vector<16x32xf32>, vector<2x32xf32> -> vector<2x32xf32>
    %c0_59 = arith.constant 0 : index
    %c6_60 = arith.constant 6 : index
    %c0_61 = arith.constant 0 : index
    %53 = vector.load %arg4[%c0_59, %c6_60, %c0_61] : memref<2x8x32xf32, #tpu.memory_space<vmem>>, vector<2x1x32xf32>
    %54 = vector.shape_cast %53 : vector<2x1x32xf32> to vector<2x32xf32>
    %55 = vector.shape_cast %52 : vector<2x32xf32> to vector<2x1x32xf32>
    tpu.vector_store %arg4[%c0_59, %c6_60, %c0_61], %55 {strides = array<i32>} : memref<2x8x32xf32, #tpu.memory_space<vmem>>, vector<2x1x32xf32>,
    %c0_62 = arith.constant 0 : index
    %c7 = arith.constant 7 : index
    %c0_63 = arith.constant 0 : index
    %56 = vector.load %arg2[%c0_62, %c7, %c0_63] : memref<2x8x16xf32, #tpu.memory_space<vmem>>, vector<2x1x16xf32>
    %57 = vector.shape_cast %56 : vector<2x1x16xf32> to vector<2x16xf32>
    %c7_64 = arith.constant 7 : index
    %c0_65 = arith.constant 0 : index
    %c0_66 = arith.constant 0 : index
    %58 = vector.load %arg3[%c7_64, %c0_65, %c0_66] : memref<8x16x32xf32, #tpu.memory_space<vmem>>, vector<1x16x32xf32>
    %59 = vector.shape_cast %58 : vector<1x16x32xf32> to vector<16x32xf32>
    %cst_67 = arith.constant dense<0.000000e+00> : vector<2x32xf32>
    %60 = tpu.matmul %57, %59, %cst_67 {dimension_numbers = #tpu.dot_dimension_numbers<[1], [0], [0], [1], [0, 0, 1, 1], [], []>} : vector<2x16xf32>, vector<16x32xf32>, vector<2x32xf32> -> vector<2x32xf32>
    %c0_68 = arith.constant 0 : index
    %c7_69 = arith.constant 7 : index
    %c0_70 = arith.constant 0 : index
    %61 = vector.load %arg4[%c0_68, %c7_69, %c0_70] : memref<2x8x32xf32, #tpu.memory_space<vmem>>, vector<2x1x32xf32>
    %62 = vector.shape_cast %61 : vector<2x1x32xf32> to vector<2x32xf32>
    %63 = vector.shape_cast %60 : vector<2x32xf32> to vector<2x1x32xf32>
    tpu.vector_store %arg4[%c0_68, %c7_69, %c0_70], %63 {strides = array<i32>} : memref<2x8x32xf32, #tpu.memory_space<vmem>>, vector<2x1x32xf32>,
    return
  }
  func.func @transform_0(%arg0: i32, %arg1: i32) -> (i32, i32, i32) {
    %c0_i32 = arith.constant 0 : i32
    %c0_i32_0 = arith.constant 0 : i32
    %c0_i32_1 = arith.constant 0 : i32
    return %arg1, %c0_i32, %c0_i32_0 : i32, i32, i32
  }
  func.func @transform_1(%arg0: i32, %arg1: i32) -> (i32, i32, i32) {
    %c0_i32 = arith.constant 0 : i32
    %c0_i32_0 = arith.constant 0 : i32
    %c0_i32_1 = arith.constant 0 : i32
    return %c0_i32, %c0_i32_0, %arg0 : i32, i32, i32
  }
  func.func @transform_2(%arg0: i32, %arg1: i32) -> (i32, i32, i32) {
    %c0_i32 = arith.constant 0 : i32
    %c0_i32_0 = arith.constant 0 : i32
    return %arg1, %c0_i32, %arg0 : i32, i32, i32
  }
}

</mosaic_0001>

<bundles_post_ra>
// kernel: vaw_encoder_forward.1
= control target key start
LH: loop header
LB: loop body
LE: loop exit
PB: predicated region body
PF: predicated region fallthrough
CT: control target
= control target key end

     0   :  { %v986_v0 = vmov 0.0   ;;  %vm18_vm0 = vcmask 1041409   ;;  %vm20_vm1 = vcmask 130048   ;;  %vm987_vm2 = vmmov 0   ;;  %s1238_s1 = inlined_call_operand.vmem [shape: f32[8,16,32], index: 1, kind: input, shape index: {}]   ;;  %s1239_s0 = inlined_call_operand.vmem [shape: f32[2,8,16], index: 0, kind: input, shape index: {}]   ;;  %s1240_s2 = inlined_call_operand.vmem [shape: f32[2,8,32], index: 2, kind: output, shape index: {}]  }
   0x1   :  { %927 = vmatprep.subr.mxu0 %v986_v0  ;;  %934 = vmatprep.subr.mxu1 %v986_v0  ;;  %v14_v1 = vld [vmem:[%s1238_s1 + $0x8] sm:$0xff]  ;;  %v883_v2 = vld [vmem:[%s1238_s1 + $0x18] sm:$0xff]  ;;  %v13_v3 = vld [vmem:[%s1238_s1] sm:$0xff]  ;;  %v988_v49 = vmov 1966171168   ;;  %v97_v51 = vlaneseq  ;;  %vm118_vm3 = vcmask 253952  }
   0x2   :  { %928 = vmatpush3.msra.mxu0 %v14_v1  ;;  %935 = vmatpush3.msra.mxu1 %v883_v2  ;;  %v882_v4 = vld [vmem:[%s1238_s1 + $0x10] sm:$0xff]  ;;  %v11_v5 = vld [vmem:[%s1239_s0] sm:$0x1]  ;;  %v12_v6 = vld [vmem:[%s1239_s0 + $0x8] sm:$0x1]  ;;  %v95_v50 = vunpack.c.l.s4 %v988_v49 }
   0x3   :  { %929 = vmatprep.subr.mxu0 %v986_v0  ;;  %936 = vmatprep.subr.mxu1 %v986_v0  ;;  %v17_v7 = vrot.slane %v12_v6, 7  ;;  %v121_v8 = vld [vmem:[%s1239_s0 + $0x1] sm:$0x1]  ;;  %v122_v9 = vld [vmem:[%s1239_s0 + $0x9] sm:$0x1]  ;;  %v889_v13 = vld [vmem:[%s1238_s1 + $0x38] sm:$0xff] }
   0x4   :  { %930 = vmatpush3.msra.mxu0 %v13_v3  ;;  %931 = vmatprep.mubr.msk.f32.mxu0 %vm987_vm2, %v986_v0  ;;  %v128_v10 = vrot.slane %v122_v9, 7  ;;  %v886_v11 = vld [vmem:[%s1238_s1 + $0x28] sm:$0xff]  ;;  %v229_v14 = vld [vmem:[%s1239_s0 + $0x2] sm:$0x1]  ;;  %v337_v18 = vld [vmem:[%s1239_s0 + $0x3] sm:$0x1]  ;;  %v96_v52 = vunpack.c.0.s8 %v95_v50 }
   0x5   :  { %937 = vmatpush3.msra.mxu1 %v882_v4  ;;  %938 = vmatprep.mubr.msk.f32.mxu1 %vm987_vm2, %v986_v0  ;;  %v19_v12 = vsel %vm18_vm0, %v17_v7, %v11_v5  ;;  %v230_v15 = vld [vmem:[%s1239_s0 + $0xa] sm:$0x1]  ;;  %v338_v19 = vld [vmem:[%s1239_s0 + $0xb] sm:$0x1]  ;;  %v885_v20 = vld [vmem:[%s1238_s1 + $0x20] sm:$0xff]  ;;  %v98_v53 = vshrl.u32 %v97_v51, 7 }
   0x6   :  { %932 = vmatmul.mubr.msk.f32.vlgmr.msra.gmra.mxu0 %vm20_vm1, %v19_v12  ;;  %v129_v16 = vsel %vm18_vm0, %v128_v10, %v121_v8  ;;  %941 = vmatprep.subr.mxu0 %v986_v0  ;;  %v236_v17 = vrot.slane %v230_v15, 7  ;;  %v344_v21 = vrot.slane %v338_v19, 7  ;;  %v888_v22 = vld [vmem:[%s1238_s1 + $0x30] sm:$0xff]  ;;  %v446_v23 = vld [vmem:[%s1239_s0 + $0xc] sm:$0x1]  ;;  %v895_v28 = vld [vmem:[%s1238_s1 + $0x58] sm:$0xff] }
   0x7   :  { %939 = vmatmul.mubr.msk.f32.vlgmr.msra.gmra.mxu1 %vm20_vm1, %v129_v16  ;;  %948 = vmatprep.subr.mxu1 %v986_v0  ;;  %v554_v24 = vld [vmem:[%s1239_s0 + $0xd] sm:$0x1]  ;;  %v452_v29 = vrot.slane %v446_v23, 7  ;;  %v445_v31 = vld [vmem:[%s1239_s0 + $0x4] sm:$0x1]  ;;  %v894_v34 = vld [vmem:[%s1238_s1 + $0x50] sm:$0xff]  ;;  %v1148_v54 = vsub.s32 %v96_v52, %v98_v53 }
   0x8   :  { %942 = vmatpush3.msra.mxu0 %v886_v11  ;;  %949 = vmatpush3.msra.mxu1 %v889_v13  ;;  %v237_v25 = vsel %vm18_vm0, %v236_v17, %v229_v14  ;;  %v345_v26 = vsel %vm18_vm0, %v344_v21, %v337_v18  ;;  %v892_v27 = vld [vmem:[%s1238_s1 + $0x48] sm:$0xff]  ;;  %v560_v30 = vrot.slane %v554_v24, 7  ;;  %v553_v32 = vld [vmem:[%s1239_s0 + $0x5] sm:$0x1]  ;;  %v901_v40 = vld [vmem:[%s1238_s1 + $0x78] sm:$0xff] }
   0x9   :  { %943 = vmatprep.subr.mxu0 %v986_v0  ;;  %950 = vmatprep.subr.mxu1 %v986_v0  ;;  %v891_v33 = vld [vmem:[%s1238_s1 + $0x40] sm:$0xff]  ;;  %v662_v35 = vld [vmem:[%s1239_s0 + $0xe] sm:$0x1]  ;;  %v770_v36 = vld [vmem:[%s1239_s0 + $0xf] sm:$0x1]  ;;  %v453_v37 = vsel %vm18_vm0, %v452_v29, %v445_v31 }
   0xa   :  { %944 = vmatpush3.msra.mxu0 %v885_v20  ;;  %945 = vmatprep.mubr.msk.f32.mxu0 %vm987_vm2, %v986_v0  ;;  %v561_v38 = vsel %vm18_vm0, %v560_v30, %v553_v32  ;;  %v898_v39 = vld [vmem:[%s1238_s1 + $0x68] sm:$0xff]  ;;  %v668_v41 = vrot.slane %v662_v35, 7  ;;  %v776_v42 = vrot.slane %v770_v36, 7  ;;  %v661_v43 = vld [vmem:[%s1239_s0 + $0x6] sm:$0x1]  ;;  %v900_v46 = vld [vmem:[%s1238_s1 + $0x70] sm:$0xff] }
   0xb   :  { %951 = vmatpush3.msra.mxu1 %v888_v22  ;;  %952 = vmatprep.mubr.msk.f32.mxu1 %vm987_vm2, %v986_v0  ;;  %v769_v44 = vld [vmem:[%s1239_s0 + $0x7] sm:$0x1] }
   0xc   :  { %946 = vmatmul.mubr.msk.f32.vlgmr.msra.gmra.mxu0 %vm20_vm1, %v237_v25  ;;  %953 = vmatmul.mubr.msk.f32.vlgmr.msra.gmra.mxu1 %vm20_vm1, %v345_v26  ;;  %v897_v45 = vld [vmem:[%s1238_s1 + $0x60] sm:$0xff]  ;;  %v669_v47 = vsel %vm18_vm0, %v668_v41, %v661_v43  ;;  %v777_v48 = vsel %vm18_vm0, %v776_v42, %v769_v44 }
   0xd   :  { %955 = vmatprep.subr.mxu0 %v986_v0  ;;  %962 = vmatprep.subr.mxu1 %v986_v0 }
   0xe   :  { %956 = vmatpush3.msra.mxu0 %v892_v27  ;;  %963 = vmatpush3.msra.mxu1 %v895_v28 }
   0xf   :  { %957 = vmatprep.subr.mxu0 %v986_v0  ;;  %964 = vmatprep.subr.mxu1 %v986_v0 }
  0x10   :  { %958 = vmatpush3.msra.mxu0 %v891_v33  ;;  %959 = vmatprep.mubr.msk.f32.mxu0 %vm987_vm2, %v986_v0 }
  0x11   :  { %965 = vmatpush3.msra.mxu1 %v894_v34  ;;  %966 = vmatprep.mubr.msk.f32.mxu1 %vm987_vm2, %v986_v0 }
  0x12   :  { %960 = vmatmul.mubr.msk.f32.vlgmr.msra.gmra.mxu0 %vm20_vm1, %v453_v37  ;;  %967 = vmatmul.mubr.msk.f32.vlgmr.msra.gmra.mxu1 %vm20_vm1, %v561_v38 }
  0x13   :  { %969 = vmatprep.subr.mxu0 %v986_v0  ;;  %976 = vmatprep.subr.mxu1 %v986_v0 }
  0x14   :  { %970 = vmatpush3.msra.mxu0 %v898_v39  ;;  %977 = vmatpush3.msra.mxu1 %v901_v40 }
  0x15   :  { %971 = vmatprep.subr.mxu0 %v986_v0  ;;  %978 = vmatprep.subr.mxu1 %v986_v0 }
  0x16   :  { %972 = vmatpush3.msra.mxu0 %v897_v45  ;;  %973 = vmatprep.mubr.msk.f32.mxu0 %vm987_vm2, %v986_v0 }
  0x17   :  { %979 = vmatpush3.msra.mxu1 %v900_v46  ;;  %980 = vmatprep.mubr.msk.f32.mxu1 %vm987_vm2, %v986_v0 }
  0x18   :  { %974 = vmatmul.mubr.msk.f32.vlgmr.msra.gmra.mxu0 %vm20_vm1, %v669_v47  ;;  %981 = vmatmul.mubr.msk.f32.vlgmr.msra.gmra.mxu1 %vm20_vm1, %v777_v48 }
  0xc6   :  { %v89_v55 = vpop.f32.mrf.mxu0 }
  0xc7   :  { %v100_v56 = vrot.slane %v89_v55, %v1148_v54  ;;  %v198_v57 = vpop.f32.mrf.mxu1 }
  0xc8   :  { %v209_v58 = vrot.slane %v198_v57, %v1148_v54  ;;  %v933_v59 = vpop.f32.mrf.mxu0 }
  0xc9   :  { %v101_v60 = vcombine.high %v100_v56, %v100_v56  ;;  %v108_v61 = vrot.slane %v100_v56, %v1148_v54  ;;  %v940_v62 = vpop.f32.mrf.mxu1 }
  0xca   :  { %v210_v63 = vcombine.high %v209_v58, %v209_v58  ;;  %v217_v0 = vrot.slane %v209_v58, %v1148_v54 }
  0xcb   :  { %v115_v1 = vrot.slane %v101_v60, %v1148_v54  ;;  %119 = vst.msk [vmem:[%s1240_s2] sm:$0x1] %vm118_vm3, %v108_v61 }
  0xcc   :  { %v224_v2 = vrot.slane %v210_v63, %v1148_v54  ;;  %227 = vst.msk [vmem:[%s1240_s2 + $0x1] sm:$0x1] %vm118_vm3, %v217_v0  ;;  %v306_v3 = vpop.f32.mrf.mxu0  ;;  %v414_v4 = vpop.f32.mrf.mxu1 }
  0xcd   :  { %120 = vst.msk [vmem:[%s1240_s2 + $0x8] sm:$0x1] %vm118_vm3, %v115_v1  ;;  %v317_v5 = vrot.slane %v306_v3, %v1148_v54  ;;  %v425_v6 = vrot.slane %v414_v4, %v1148_v54 }
  0xce   :  { %228 = vst.msk [vmem:[%s1240_s2 + $0x9] sm:$0x1] %vm118_vm3, %v224_v2  ;;  %v947_v7 = vpop.f32.mrf.mxu0  ;;  %v954_v8 = vpop.f32.mrf.mxu1 }
  0xcf   :  { %v318_v9 = vcombine.high %v317_v5, %v317_v5  ;;  %v325_v10 = vrot.slane %v317_v5, %v1148_v54  ;;  %v426_v11 = vcombine.high %v425_v6, %v425_v6  ;;  %v433_v12 = vrot.slane %v425_v6, %v1148_v54 }
  0xd1   :  { %v332_v13 = vrot.slane %v318_v9, %v1148_v54  ;;  %335 = vst.msk [vmem:[%s1240_s2 + $0x2] sm:$0x1] %vm118_vm3, %v325_v10  ;;  %v440_v14 = vrot.slane %v426_v11, %v1148_v54  ;;  %443 = vst.msk [vmem:[%s1240_s2 + $0x3] sm:$0x1] %vm118_vm3, %v433_v12 }
  0xd2   :  { %v522_v15 = vpop.f32.mrf.mxu0  ;;  %v630_v16 = vpop.f32.mrf.mxu1 }
  0xd3   :  { %336 = vst.msk [vmem:[%s1240_s2 + $0xa] sm:$0x1] %vm118_vm3, %v332_v13  ;;  %444 = vst.msk [vmem:[%s1240_s2 + $0xb] sm:$0x1] %vm118_vm3, %v440_v14  ;;  %v533_v17 = vrot.slane %v522_v15, %v1148_v54  ;;  %v641_v18 = vrot.slane %v630_v16, %v1148_v54 }
  0xd4   :  { %v961_v19 = vpop.f32.mrf.mxu0  ;;  %v968_v20 = vpop.f32.mrf.mxu1 }
  0xd5   :  { %v534_v21 = vcombine.high %v533_v17, %v533_v17  ;;  %v541_v22 = vrot.slane %v533_v17, %v1148_v54  ;;  %v642_v23 = vcombine.high %v641_v18, %v641_v18  ;;  %v649_v24 = vrot.slane %v641_v18, %v1148_v54 }
  0xd7   :  { %v548_v25 = vrot.slane %v534_v21, %v1148_v54  ;;  %551 = vst.msk [vmem:[%s1240_s2 + $0x4] sm:$0x1] %vm118_vm3, %v541_v22  ;;  %v656_v26 = vrot.slane %v642_v23, %v1148_v54  ;;  %659 = vst.msk [vmem:[%s1240_s2 + $0x5] sm:$0x1] %vm118_vm3, %v649_v24 }
  0xd8   :  { %v738_v27 = vpop.f32.mrf.mxu0  ;;  %v846_v28 = vpop.f32.mrf.mxu1 }
  0xd9   :  { %552 = vst.msk [vmem:[%s1240_s2 + $0xc] sm:$0x1] %vm118_vm3, %v548_v25  ;;  %660 = vst.msk [vmem:[%s1240_s2 + $0xd] sm:$0x1] %vm118_vm3, %v656_v26  ;;  %v749_v29 = vrot.slane %v738_v27, %v1148_v54  ;;  %v857_v30 = vrot.slane %v846_v28, %v1148_v54 }
  0xda   :  { %v975_v31 = vpop.f32.mrf.mxu0  ;;  %v982_v32 = vpop.f32.mrf.mxu1 }
  0xdb   :  { %v750_v33 = vcombine.high %v749_v29, %v749_v29  ;;  %v757_v34 = vrot.slane %v749_v29, %v1148_v54  ;;  %v858_v35 = vcombine.high %v857_v30, %v857_v30  ;;  %v865_v36 = vrot.slane %v857_v30, %v1148_v54 }
  0xdd   :  { %v764_v37 = vrot.slane %v750_v33, %v1148_v54  ;;  %767 = vst.msk [vmem:[%s1240_s2 + $0x6] sm:$0x1] %vm118_vm3, %v757_v34  ;;  %v872_v38 = vrot.slane %v858_v35, %v1148_v54  ;;  %875 = vst.msk [vmem:[%s1240_s2 + $0x7] sm:$0x1] %vm118_vm3, %v865_v36 }
  0xdf   :  { %768 = vst.msk [vmem:[%s1240_s2 + $0xe] sm:$0x1] %vm118_vm3, %v764_v37  ;;  %876 = vst.msk [vmem:[%s1240_s2 + $0xf] sm:$0x1] %vm118_vm3, %v872_v38 }

</bundles_post_ra>
